<compile_context>
chip_gen: v7x
topology: tpu7x:2x2x1
jax: 0.10.0
libtpu: 0.0.40
codegen_flags: <defaults>
</compile_context>

<pallas_src>
from functools import partial

import jax
import jax.numpy as jnp
from jax.experimental import pallas as pl
from jax.experimental.pallas import tpu as pltpu


def _round_up(n, m):
    return ((n + m - 1) // m) * m


# ---------------------------------------------------------------------------
# Kernel 1: complex spectral multiply, Cout-tiled
#   out[b, o, l] = sum_i x[b, i, l] * w[i, o, l]      (complex, per-lane l)
# ---------------------------------------------------------------------------
def _spectral_mul_kernel(xr_ref, xi_ref, wr_ref, wi_ref, or_ref, oi_ref):
    xr = xr_ref[0][:, None, :]                 # (Cin_p, 1, Lp)  sublane-broadcast
    xi = xi_ref[0][:, None, :]
    wr = wr_ref[...]                           # (Cin_p, TCO, Lp)
    wi = wi_ref[...]
    # plain 4-mult complex product, reduced over the (small) Cin axis on the VPU;
    # temporaries are only (Cin_p, TCO, Lp) thanks to the Cout tiling.
    or_ref[0] = jnp.sum(wr * xr - wi * xi, axis=0)   # real part, (TCO, Lp)
    oi_ref[0] = jnp.sum(wr * xi + wi * xr, axis=0)   # imag part, (TCO, Lp)


def spectral_mul(xr, xi, wr, wi):
    """xr/xi: (B, Cin_p, Lp) f32; wr/wi: (Cin_p, Cout_p, Lp) f32
       -> real/imag parts of sum_i x[b,i,l]*w[i,o,l], each (B, Cout_p, Lp) f32."""
    B, Cin_p, Lp = xr.shape
    Cout_p = wr.shape[1]
    tco = 8                                    # Cout tile (Cout_p is a multiple of 8)
    n_co = Cout_p // tco

    xspec = pl.BlockSpec((1, Cin_p, Lp), lambda b, co: (b, 0, 0))   # re-used across co
    wspec = pl.BlockSpec((Cin_p, tco, Lp), lambda b, co: (0, co, 0))
    ospec = pl.BlockSpec((1, tco, Lp), lambda b, co: (b, co, 0))

    cost = pl.CostEstimate(
        flops=8 * B * Cin_p * Cout_p * Lp,
        transcendentals=0,
        bytes_accessed=4 * (2 * B * Cin_p * Lp + 2 * Cin_p * Cout_p * Lp
                            + 2 * B * Cout_p * Lp))

    # VMEM budget at production sizes (Cin=Cout=64, Lp=384):
    #   x blocks 2*2*98KB + w blocks 2*2*786KB + out 2*2*2*12KB + temps ~3MB  ~= 7 MB
    # comfortably below the 32 MiB scoped limit and v7x's 64 MiB physical VMEM.
    return pl.pallas_call(
        _spectral_mul_kernel,
        out_shape=(jax.ShapeDtypeStruct((B, Cout_p, Lp), jnp.float32),
                   jax.ShapeDtypeStruct((B, Cout_p, Lp), jnp.float32)),
        grid_spec=pltpu.PrefetchScalarGridSpec(
            num_scalar_prefetch=0, grid=(B, n_co),
            in_specs=[xspec, xspec, wspec, wspec],
            out_specs=(ospec, ospec)),
        cost_estimate=cost,
        compiler_params=pltpu.CompilerParams(
            dimension_semantics=("parallel", "parallel"),
            vmem_limit_bytes=32 * 1024 * 1024),
    )(xr, xi, wr, wi)


# ---------------------------------------------------------------------------
# Kernel 2: 1x1 conv (channel contraction) + bias + residual add, NCHW-native
# ---------------------------------------------------------------------------
def _conv1x1_add_kernel(x_ref, w_ref, b_ref, x1_ref, o_ref, *, use_mxu):
    # x_ref: (1, Cin, TN), w_ref: (Cout, Cin), b_ref: (Cout, 1), x1/o: (1, Cout, TN)
    x = x_ref[0]
    if use_mxu:
        y = jnp.dot(w_ref[...], x, preferred_element_type=jnp.float32)
        o_ref[0] = y + b_ref[...] + x1_ref[0]
    else:
        # Tiny channel counts: MXU would be <1% utilized and its wind-up sits on the
        # critical path of a vld/vst-bound kernel -> unrolled VPU MAC over Cin.
        acc = x1_ref[0] + b_ref[...]                       # (Cout, TN)
        for i in range(x_ref.shape[1]):                    # static, small Cin
            acc = acc + w_ref[:, i:i + 1] * x[i:i + 1, :]
        o_ref[0] = acc


def _pick_tile(n, cap=8192):
    """Largest multiple of 128 dividing n (<= cap); fall back to full extent."""
    if n % 128 == 0:
        t = min(cap, n)
        t -= t % 128
        while t >= 128:
            if n % t == 0:
                return t
            t -= 128
    return n


def conv1x1_add(x, w, b, x1):
    """x: (B, Cin, N), w: (Cout, Cin), b: (Cout,), x1: (B, Cout, N) -> (B, Cout, N)."""
    B, Cin, N = x.shape
    Cout = w.shape[0]
    tn = _pick_tile(N)                         # HBM-bound: big lane tiles amortize step overhead
    grid = (B, N // tn)
    use_mxu = min(Cin, Cout) >= 32

    cost = pl.CostEstimate(
        flops=B * N * (2 * Cin * Cout + 2 * Cout),
        transcendentals=0,
        bytes_accessed=4 * (B * Cin * N + 2 * B * Cout * N + Cout * Cin + Cout))

    return pl.pallas_call(
        partial(_conv1x1_add_kernel, use_mxu=use_mxu),
        out_shape=jax.ShapeDtypeStruct((B, Cout, N), jnp.float32),
        grid_spec=pltpu.PrefetchScalarGridSpec(
            num_scalar_prefetch=0, grid=grid,
            in_specs=[pl.BlockSpec((1, Cin, tn), lambda bi, ti: (bi, 0, ti)),
                      pl.BlockSpec((Cout, Cin), lambda bi, ti: (0, 0)),     # grid-invariant
                      pl.BlockSpec((Cout, 1), lambda bi, ti: (0, 0)),       # grid-invariant
                      pl.BlockSpec((1, Cout, tn), lambda bi, ti: (bi, 0, ti))],
            out_specs=pl.BlockSpec((1, Cout, tn), lambda bi, ti: (bi, 0, ti))),
        input_output_aliases={3: 0},   # reuse the residual (spectral) buffer as output
        cost_estimate=cost,
        compiler_params=pltpu.CompilerParams(
            dimension_semantics=("parallel", "parallel"),
            vmem_limit_bytes=32 * 1024 * 1024),
    )(x, w, b.reshape(Cout, 1), x1)


# ---------------------------------------------------------------------------
# One-time (init-time) parameter prep: band concat, lane pad to 128, channel pad to 8
# ---------------------------------------------------------------------------
def prepare_params(params, modes1, modes2):
    w1r, w1i, w2r, w2i, wconv, bconv = params
    Cin, Cout = w1r.shape[0], w1r.shape[1]
    F = modes1 * modes2
    L = 2 * F
    Lp = _round_up(max(L, 128), 128)
    Cin_p = _round_up(Cin, 8)
    Cout_p = _round_up(Cout, 8)

    wbr = jnp.concatenate([w1r.reshape(Cin, Cout, F),
                           w2r.reshape(Cin, Cout, F)], axis=-1)
    wbi = jnp.concatenate([w1i.reshape(Cin, Cout, F),
                           w2i.reshape(Cin, Cout, F)], axis=-1)
    pad = ((0, Cin_p - Cin), (0, Cout_p - Cout), (0, Lp - L))
    wbr = jnp.pad(wbr, pad)
    wbi = jnp.pad(wbi, pad)
    return (wbr, wbi, wconv, bconv)


# ---------------------------------------------------------------------------
# Block forward (glue in plain JAX, learned-weight compute in Pallas)
# ---------------------------------------------------------------------------
def block_forward(x, prep, modes1, modes2):
    wbr, wbi, wconv, bconv = prep
    B, Cin, H, W = x.shape
    Cin_p, Cout_p, Lp = wbr.shape
    Cout = wconv.shape[0]
    F = modes1 * modes2
    L = 2 * F
    Wf = W // 2 + 1

    # TODO(synk): FFT/IFFT have no Pallas TPU equivalent; computed with jnp.fft.
    x_ft = jnp.fft.rfftn(x, axes=(-2, -1))                 # (B, Cin, H, Wf) complex64

    low = x_ft[:, :, :modes1, :modes2].reshape(B, Cin, F)
    high = x_ft[:, :, H - modes1:, :modes2].reshape(B, Cin, F)
    xm = jnp.concatenate([low, high], axis=-1)             # (B, Cin, 2F)
    xm = jnp.pad(xm, ((0, 0), (0, Cin_p - Cin), (0, Lp - L)))

    o_r, o_i = spectral_mul(jnp.real(xm), jnp.imag(xm), wbr, wbi)
    out_c = jax.lax.complex(o_r[:, :Cout, :L], o_i[:, :Cout, :L])   # (B, Cout, 2F)

    out_ft = jnp.zeros((B, Cout, H, Wf), jnp.complex64)
    out_ft = out_ft.at[:, :, :modes1, :modes2].set(
        out_c[:, :, :F].reshape(B, Cout, modes1, modes2))
    out_ft = out_ft.at[:, :, H - modes1:, :modes2].set(
        out_c[:, :, F:].reshape(B, Cout, modes1, modes2))

    x1 = jnp.fft.irfft2(out_ft, s=(H, W), axes=(-2, -1)).astype(jnp.float32)

    # 1x1 conv + bias + spectral-branch add, NCHW-native (reshapes are free views).
    out = conv1x1_add(x.reshape(B, Cin, H * W), wconv, bconv,
                      x1.reshape(B, Cout, H * W))
    return out.reshape(B, Cout, H, W)


# ---------------------------------------------------------------------------
# Pure-JAX reference (mirrors the PyTorch forward) for a sanity check
# ---------------------------------------------------------------------------
def reference_forward(x, params, modes1, modes2):
    w1r, w1i, w2r, w2i, wconv, bconv = params
    w1 = w1r + 1j * w1i
    w2 = w2r + 1j * w2i
    B, Cin, H, W = x.shape
    Cout = wconv.shape[0]
    x_ft = jnp.fft.rfftn(x, axes=(-2, -1))
    out_ft = jnp.zeros((B, Cout, H, W // 2 + 1), jnp.complex64)
    out_ft = out_ft.at[:, :, :modes1, :modes2].set(
        jnp.einsum('bixy,ioxy->boxy', x_ft[:, :, :modes1, :modes2], w1))
    out_ft = out_ft.at[:, :, H - modes1:, :modes2].set(
        jnp.einsum('bixy,ioxy->boxy', x_ft[:, :, H - modes1:, :modes2], w2))
    x1 = jnp.fft.irfft2(out_ft, s=(H, W), axes=(-2, -1))
    x2 = jnp.einsum('oi,bihw->bohw', wconv, x) + bconv[None, :, None, None]
    return x1 + x2


if __name__ == "__main__":
    B, Cin, Cout, H, W = 2, 4, 4, 16, 16
    modes1, modes2 = 4, 4

    key = jax.random.PRNGKey(0)
    k = jax.random.split(key, 8)
    scale = 1.0 / (Cin * Cout)

    # SpectralConv2d weights: complex, stored as real/imag planes (Cin, Cout, m1, m2)
    w1r = scale * jax.random.uniform(k[0], (Cin, Cout, modes1, modes2), jnp.float32)
    w1i = scale * jax.random.uniform(k[1], (Cin, Cout, modes1, modes2), jnp.float32)
    w2r = scale * jax.random.uniform(k[2], (Cin, Cout, modes1, modes2), jnp.float32)
    w2i = scale * jax.random.uniform(k[3], (Cin, Cout, modes1, modes2), jnp.float32)

    # nn.Conv2d(in, out, 1): weight (Cout, Cin, 1, 1) -> stored as (Cout, Cin), bias (Cout,)
    bound = 1.0 / jnp.sqrt(Cin)
    wconv = jax.random.uniform(k[4], (Cout, Cin), jnp.float32, -bound, bound)
    bconv = jax.random.uniform(k[5], (Cout,), jnp.float32, -bound, bound)

    params = (w1r, w1i, w2r, w2i, wconv, bconv)
    prep = prepare_params(params, modes1, modes2)   # one-time weight prep

    x = jax.random.normal(k[6], (B, Cin, H, W), jnp.float32)   # NCHW, like PyTorch

    block_fn = jax.jit(block_forward, static_argnums=(2, 3))
    out = jax.block_until_ready(block_fn(x, prep, modes1, modes2))

    ref = jax.block_until_ready(reference_forward(x, params, modes1, modes2))
    assert out.shape == (B, Cout, H, W)
    assert jnp.allclose(out, ref, atol=1e-4, rtol=1e-4), "mismatch vs reference"

    print("KERNEL_OK")
</pallas_src>

<mosaic_0001>
module attributes {stable_mosaic.version = 11 : i64} {
  func.func @_spectral_mul_kernel(%arg0: i32, %arg1: i32, %arg2: memref<1x8x128xf32, #tpu.memory_space<vmem>>, %arg3: memref<1x8x128xf32, #tpu.memory_space<vmem>>, %arg4: memref<8x8x128xf32, #tpu.memory_space<vmem>>, %arg5: memref<8x8x128xf32, #tpu.memory_space<vmem>>, %arg6: memref<1x8x128xf32, #tpu.memory_space<vmem>>, %arg7: memref<1x8x128xf32, #tpu.memory_space<vmem>>) attributes {dimension_semantics = [#tpu.dimension_semantics<parallel>, #tpu.dimension_semantics<parallel>], iteration_bounds = array<i64: 2, 1>, scalar_prefetch = 0 : i64, scratch_operands = 0 : i64, tpu.core_type = #tpu.core_type<tc>, window_params = [{transform_indices = @transform_0, window_bounds = array<i64: 1, 8, 128>}, {transform_indices = @transform_1, window_bounds = array<i64: 1, 8, 128>}, {transform_indices = @transform_2, window_bounds = array<i64: 8, 8, 128>}, {transform_indices = @transform_3, window_bounds = array<i64: 8, 8, 128>}, {transform_indices = @transform_4, window_bounds = array<i64: 1, 8, 128>}, {transform_indices = @transform_5, window_bounds = array<i64: 1, 8, 128>}]} {
    %c0 = arith.constant 0 : index
    %c0_0 = arith.constant 0 : index
    %c0_1 = arith.constant 0 : index
    %0 = vector.load %arg2[%c0, %c0_0, %c0_1] : memref<1x8x128xf32, #tpu.memory_space<vmem>>, vector<1x8x128xf32>
    %1 = vector.shape_cast %0 : vector<1x8x128xf32> to vector<8x128xf32>
    %2 = vector.shape_cast %1 : vector<8x128xf32> to vector<8x1x128xf32>
    %c0_2 = arith.constant 0 : index
    %c0_3 = arith.constant 0 : index
    %c0_4 = arith.constant 0 : index
    %3 = vector.load %arg3[%c0_2, %c0_3, %c0_4] : memref<1x8x128xf32, #tpu.memory_space<vmem>>, vector<1x8x128xf32>
    %4 = vector.shape_cast %3 : vector<1x8x128xf32> to vector<8x128xf32>
    %5 = vector.shape_cast %4 : vector<8x128xf32> to vector<8x1x128xf32>
    %c0_5 = arith.constant 0 : index
    %c0_6 = arith.constant 0 : index
    %c0_7 = arith.constant 0 : index
    %6 = vector.load %arg4[%c0_5, %c0_6, %c0_7] : memref<8x8x128xf32, #tpu.memory_space<vmem>>, vector<8x8x128xf32>
    %c0_8 = arith.constant 0 : index
    %c0_9 = arith.constant 0 : index
    %c0_10 = arith.constant 0 : index
    %7 = vector.load %arg5[%c0_8, %c0_9, %c0_10] : memref<8x8x128xf32, #tpu.memory_space<vmem>>, vector<8x8x128xf32>
    %8 = vector.broadcast %2 : vector<8x1x128xf32> to vector<8x8x128xf32>
    %9 = arith.mulf %6, %8 : vector<8x8x128xf32>
    %10 = vector.broadcast %5 : vector<8x1x128xf32> to vector<8x8x128xf32>
    %11 = arith.mulf %7, %10 : vector<8x8x128xf32>
    %12 = arith.subf %9, %11 : vector<8x8x128xf32>
    %cst = arith.constant dense<0.000000e+00> : vector<8x128xf32>
    %13 = vector.multi_reduction <add>, %12, %cst [0] : vector<8x8x128xf32> to vector<8x128xf32>
    %c0_11 = arith.constant 0 : index
    %c0_12 = arith.constant 0 : index
    %c0_13 = arith.constant 0 : index
    %14 = vector.load %arg6[%c0_11, %c0_12, %c0_13] : memref<1x8x128xf32, #tpu.memory_space<vmem>>, vector<1x8x128xf32>
    %15 = vector.shape_cast %14 : vector<1x8x128xf32> to vector<8x128xf32>
    %16 = vector.shape_cast %13 : vector<8x128xf32> to vector<1x8x128xf32>
    tpu.vector_store %arg6[%c0_11, %c0_12, %c0_13], %16 {strides = array<i32>} : memref<1x8x128xf32, #tpu.memory_space<vmem>>, vector<1x8x128xf32>,
    %17 = vector.broadcast %5 : vector<8x1x128xf32> to vector<8x8x128xf32>
    %18 = arith.mulf %6, %17 : vector<8x8x128xf32>
    %19 = vector.broadcast %2 : vector<8x1x128xf32> to vector<8x8x128xf32>
    %20 = arith.mulf %7, %19 : vector<8x8x128xf32>
    %21 = arith.addf %18, %20 : vector<8x8x128xf32>
    %cst_14 = arith.constant dense<0.000000e+00> : vector<8x128xf32>
    %22 = vector.multi_reduction <add>, %21, %cst_14 [0] : vector<8x8x128xf32> to vector<8x128xf32>
    %c0_15 = arith.constant 0 : index
    %c0_16 = arith.constant 0 : index
    %c0_17 = arith.constant 0 : index
    %23 = vector.load %arg7[%c0_15, %c0_16, %c0_17] : memref<1x8x128xf32, #tpu.memory_space<vmem>>, vector<1x8x128xf32>
    %24 = vector.shape_cast %23 : vector<1x8x128xf32> to vector<8x128xf32>
    %25 = vector.shape_cast %22 : vector<8x128xf32> to vector<1x8x128xf32>
    tpu.vector_store %arg7[%c0_15, %c0_16, %c0_17], %25 {strides = array<i32>} : memref<1x8x128xf32, #tpu.memory_space<vmem>>, vector<1x8x128xf32>,
    return
  }
  func.func @transform_0(%arg0: i32, %arg1: i32) -> (i32, i32, i32) {
    %c0_i32 = arith.constant 0 : i32
    %c0_i32_0 = arith.constant 0 : i32
    %c0_i32_1 = arith.constant 0 : i32
    return %arg0, %c0_i32, %c0_i32_0 : i32, i32, i32
  }
  func.func @transform_1(%arg0: i32, %arg1: i32) -> (i32, i32, i32) {
    %c0_i32 = arith.constant 0 : i32
    %c0_i32_0 = arith.constant 0 : i32
    %c0_i32_1 = arith.constant 0 : i32
    return %arg0, %c0_i32, %c0_i32_0 : i32, i32, i32
  }
  func.func @transform_2(%arg0: i32, %arg1: i32) -> (i32, i32, i32) {
    %c0_i32 = arith.constant 0 : i32
    %c0_i32_0 = arith.constant 0 : i32
    %c0_i32_1 = arith.constant 0 : i32
    return %c0_i32, %arg1, %c0_i32_0 : i32, i32, i32
  }
  func.func @transform_3(%arg0: i32, %arg1: i32) -> (i32, i32, i32) {
    %c0_i32 = arith.constant 0 : i32
    %c0_i32_0 = arith.constant 0 : i32
    %c0_i32_1 = arith.constant 0 : i32
    return %c0_i32, %arg1, %c0_i32_0 : i32, i32, i32
  }
  func.func @transform_4(%arg0: i32, %arg1: i32) -> (i32, i32, i32) {
    %c0_i32 = arith.constant 0 : i32
    %c0_i32_0 = arith.constant 0 : i32
    return %arg0, %arg1, %c0_i32 : i32, i32, i32
  }
  func.func @transform_5(%arg0: i32, %arg1: i32) -> (i32, i32, i32) {
    %c0_i32 = arith.constant 0 : i32
    %c0_i32_0 = arith.constant 0 : i32
    return %arg0, %arg1, %c0_i32 : i32, i32, i32
  }
}

module attributes {stable_mosaic.version = 11 : i64} {
  func.func @_conv1x1_add_kernel(%arg0: i32, %arg1: i32, %arg2: memref<1x4x256xf32, #tpu.memory_space<vmem>>, %arg3: memref<4x4xf32, #tpu.memory_space<vmem>>, %arg4: memref<4x1xf32, #tpu.memory_space<vmem>>, %arg5: memref<1x4x256xf32, #tpu.memory_space<vmem>>, %arg6: memref<1x4x256xf32, #tpu.memory_space<vmem>>) attributes {dimension_semantics = [#tpu.dimension_semantics<parallel>, #tpu.dimension_semantics<parallel>], iteration_bounds = array<i64: 2, 1>, scalar_prefetch = 0 : i64, scratch_operands = 0 : i64, tpu.core_type = #tpu.core_type<tc>, window_params = [{transform_indices = @transform_0, window_bounds = array<i64: 1, 4, 256>}, {pipeline_mode = #tpu.pipeline_mode<synchronous>, transform_indices = @transform_1, window_bounds = array<i64: 4, 4>}, {pipeline_mode = #tpu.pipeline_mode<synchronous>, transform_indices = @transform_2, window_bounds = array<i64: 4, 1>}, {transform_indices = @transform_3, window_bounds = array<i64: 1, 4, 256>}, {transform_indices = @transform_4, window_bounds = array<i64: 1, 4, 256>}]} {
    %c0 = arith.constant 0 : index
    %c0_0 = arith.constant 0 : index
    %c0_1 = arith.constant 0 : index
    %0 = vector.load %arg2[%c0, %c0_0, %c0_1] : memref<1x4x256xf32, #tpu.memory_space<vmem>>, vector<1x4x256xf32>
    %1 = vector.shape_cast %0 : vector<1x4x256xf32> to vector<4x256xf32>
    %c0_2 = arith.constant 0 : index
    %c0_3 = arith.constant 0 : index
    %c0_4 = arith.constant 0 : index
    %2 = vector.load %arg5[%c0_2, %c0_3, %c0_4] : memref<1x4x256xf32, #tpu.memory_space<vmem>>, vector<1x4x256xf32>
    %3 = vector.shape_cast %2 : vector<1x4x256xf32> to vector<4x256xf32>
    %c0_5 = arith.constant 0 : index
    %c0_6 = arith.constant 0 : index
    %4 = vector.load %arg4[%c0_5, %c0_6] : memref<4x1xf32, #tpu.memory_space<vmem>>, vector<4x1xf32>
    %5 = vector.broadcast %4 : vector<4x1xf32> to vector<4x256xf32>
    %6 = arith.addf %3, %5 : vector<4x256xf32>
    %c0_7 = arith.constant 0 : index
    %c0_8 = arith.constant 0 : index
    %7 = vector.load %arg3[%c0_7, %c0_8] : memref<4x4xf32, #tpu.memory_space<vmem>>, vector<4x1xf32>
    %8 = vector.extract_strided_slice %1 {offsets = [0, 0], sizes = [1, 256], strides = [1, 1]} : vector<4x256xf32> to vector<1x256xf32>
    %9 = vector.broadcast %7 : vector<4x1xf32> to vector<4x256xf32>
    %10 = vector.broadcast %8 : vector<1x256xf32> to vector<4x256xf32>
    %11 = arith.mulf %9, %10 : vector<4x256xf32>
    %12 = arith.addf %6, %11 : vector<4x256xf32>
    %c0_9 = arith.constant 0 : index
    %c1 = arith.constant 1 : index
    %13 = vector.load %arg3[%c0_9, %c1] : memref<4x4xf32, #tpu.memory_space<vmem>>, vector<4x1xf32>
    %14 = vector.extract_strided_slice %1 {offsets = [1, 0], sizes = [1, 256], strides = [1, 1]} : vector<4x256xf32> to vector<1x256xf32>
    %15 = vector.broadcast %13 : vector<4x1xf32> to vector<4x256xf32>
    %16 = vector.broadcast %14 : vector<1x256xf32> to vector<4x256xf32>
    %17 = arith.mulf %15, %16 : vector<4x256xf32>
    %18 = arith.addf %12, %17 : vector<4x256xf32>
    %c0_10 = arith.constant 0 : index
    %c2 = arith.constant 2 : index
    %19 = vector.load %arg3[%c0_10, %c2] : memref<4x4xf32, #tpu.memory_space<vmem>>, vector<4x1xf32>
    %20 = vector.extract_strided_slice %1 {offsets = [2, 0], sizes = [1, 256], strides = [1, 1]} : vector<4x256xf32> to vector<1x256xf32>
    %21 = vector.broadcast %19 : vector<4x1xf32> to vector<4x256xf32>
    %22 = vector.broadcast %20 : vector<1x256xf32> to vector<4x256xf32>
    %23 = arith.mulf %21, %22 : vector<4x256xf32>
    %24 = arith.addf %18, %23 : vector<4x256xf32>
    %c0_11 = arith.constant 0 : index
    %c3 = arith.constant 3 : index
    %25 = vector.load %arg3[%c0_11, %c3] : memref<4x4xf32, #tpu.memory_space<vmem>>, vector<4x1xf32>
    %26 = vector.extract_strided_slice %1 {offsets = [3, 0], sizes = [1, 256], strides = [1, 1]} : vector<4x256xf32> to vector<1x256xf32>
    %27 = vector.broadcast %25 : vector<4x1xf32> to vector<4x256xf32>
    %28 = vector.broadcast %26 : vector<1x256xf32> to vector<4x256xf32>
    %29 = arith.mulf %27, %28 : vector<4x256xf32>
    %30 = arith.addf %24, %29 : vector<4x256xf32>
    %c0_12 = arith.constant 0 : index
    %c0_13 = arith.constant 0 : index
    %c0_14 = arith.constant 0 : index
    %31 = vector.load %arg6[%c0_12, %c0_13, %c0_14] : memref<1x4x256xf32, #tpu.memory_space<vmem>>, vector<1x4x256xf32>
    %32 = vector.shape_cast %31 : vector<1x4x256xf32> to vector<4x256xf32>
    %33 = vector.shape_cast %30 : vector<4x256xf32> to vector<1x4x256xf32>
    tpu.vector_store %arg6[%c0_12, %c0_13, %c0_14], %33 {strides = array<i32>} : memref<1x4x256xf32, #tpu.memory_space<vmem>>, vector<1x4x256xf32>,
    return
  }
  func.func @transform_0(%arg0: i32, %arg1: i32) -> (i32, i32, i32) {
    %c0_i32 = arith.constant 0 : i32
    %c0_i32_0 = arith.constant 0 : i32
    return %arg0, %c0_i32, %arg1 : i32, i32, i32
  }
  func.func @transform_1(%arg0: i32, %arg1: i32) -> (i32, i32) {
    %c0_i32 = arith.constant 0 : i32
    %c0_i32_0 = arith.constant 0 : i32
    %c0_i32_1 = arith.constant 0 : i32
    return %c0_i32, %c0_i32_0 : i32, i32
  }
  func.func @transform_2(%arg0: i32, %arg1: i32) -> (i32, i32) {
    %c0_i32 = arith.constant 0 : i32
    %c0_i32_0 = arith.constant 0 : i32
    %c0_i32_1 = arith.constant 0 : i32
    return %c0_i32, %c0_i32_0 : i32, i32
  }
  func.func @transform_3(%arg0: i32, %arg1: i32) -> (i32, i32, i32) {
    %c0_i32 = arith.constant 0 : i32
    %c0_i32_0 = arith.constant 0 : i32
    return %arg0, %c0_i32, %arg1 : i32, i32, i32
  }
  func.func @transform_4(%arg0: i32, %arg1: i32) -> (i32, i32, i32) {
    %c0_i32 = arith.constant 0 : i32
    %c0_i32_0 = arith.constant 0 : i32
    return %arg0, %c0_i32, %arg1 : i32, i32, i32
  }
}

</mosaic_0001>

<bundles_post_ra>
// kernel: block_forward.2
= control target key start
LH: loop header
LB: loop body
LE: loop exit
PB: predicated region body
PF: predicated region fallthrough
CT: control target
= control target key end

     0   :  { %s822_s18 = smov 0   ;;  %s824_s19 = smov 0   ;;  %s923_s0 = inlined_call_operand.vmem [shape: f32[2,8,128], index: 0, kind: input, shape index: {}]   ;;  %s924_s1 = inlined_call_operand.vmem [shape: f32[2,8,128], index: 1, kind: input, shape index: {}]   ;;  %s925_s2 = inlined_call_operand.vmem [shape: f32[8,8,128], index: 2, kind: input, shape index: {}]   ;;  %s926_s3 = inlined_call_operand.vmem [shape: f32[8,8,128], index: 3, kind: input, shape index: {}]   ;;  %s927_s4 = inlined_call_operand.vmem [shape: f32[2,8,128], index: 4, kind: output, shape index: {0}]   ;;  %s928_s5 = inlined_call_operand.vmem [shape: f32[2,8,128], index: 5, kind: output, shape index: {1}]  }
   0x1   :  { %s826_s20 = smov 0  }
   0x2 LB: > { %s28_s21 = sadd.s32 1, %s785_s19  ;;  %p733_p0 = scmp.ge.s32.totalorder %s789_s20, 1  ;;  %s789_s20 = sphi %s826_s20, %s16_s20   ;;  %s785_s19 = sphi %s824_s19, %s930_s19   ;;  %s781_s18 = sphi %s822_s18, %s929_s18  }
   0x3   : > { %p30_p1 = scmp.ge.s32.totalorder %s28_s21, 2  ;;  %p232_p2 = scmp.lt.s32.totalorder %s789_s20, 3 }
   0x5   : > { %s932_s21 = smov (%p30_p1, %s28_s21), 0  ;;  %p233_p3 = pnand %p733_p0, %p232_p2 }
   0x6   : > { %p280_p4 = scmp.lt.s32.totalorder (!%p233_p3), %s781_s18, 1  ;;  %v316_v0 = vlaneseq (!%p233_p3)  ;;  %v791_v1 = vmov (!%p233_p3), 1966171168   ;;  %v412_v32 = vld [vmem:[%s925_s2] sm:$0xff] (!%p233_p3)  ;;  %v413_v33 = vld [vmem:[%s925_s2 + $0x8] sm:$0xff] (!%p233_p3)  ;;  %v414_v36 = vld [vmem:[%s925_s2 + $0x10] sm:$0xff] (!%p233_p3) }
   0x7   : > { %236 = sbr.rel (%p233_p3) target bundleno = 56 (0x38), region = 36  ;;  %v314_v2 = vunpack.c.l.s4 (!%p233_p3), %v791_v1  ;;  %v415_v41 = vld [vmem:[%s925_s2 + $0x18] sm:$0xff] (!%p233_p3)  ;;  %v420_v42 = vld [vmem:[%s926_s3] sm:$0xff] (!%p233_p3)  ;;  %v421_v45 = vld [vmem:[%s926_s3 + $0x8] sm:$0xff] (!%p233_p3) }
   0x8   : > { %v317_v3 = vshrl.u32 (!%p233_p3), %v316_v0, 7  ;;  %v422_v46 = vld [vmem:[%s926_s3 + $0x10] sm:$0xff] (!%p233_p3)  ;;  %v423_v47 = vld [vmem:[%s926_s3 + $0x18] sm:$0xff] (!%p233_p3)  ;;  %v416_v51 = vld [vmem:[%s925_s2 + $0x20] sm:$0xff] (!%p233_p3) }
   0x9   : > { %v315_v4 = vunpack.c.0.s8 (!%p233_p3), %v314_v2  ;;  %v424_v56 = vld [vmem:[%s926_s3 + $0x20] sm:$0xff] (!%p233_p3)  ;;  %v417_v61 = vld [vmem:[%s925_s2 + $0x28] sm:$0xff] (!%p233_p3) }
   0xa   : > { %v430_v17 = vsub.s32 (!%p233_p3), 0, %v317_v3  ;;  %v425_v2 = vld [vmem:[%s926_s3 + $0x28] sm:$0xff] (!%p233_p3) }
   0xb   : > { %v318_v5 = vsub.s32 (!%p233_p3), %v315_v4, %v317_v3 }
   0xe   : > { %s934_s18 = smov (!%p280_p4, %s781_s18), 1 }
   0xf   : > { %s840_s22 = sshll.u32 %s934_s18, 3 }
  0x10   : > { %s283_s25 = scalar_lea.vmem %s923_s0, %s840_s22  ;;  %s287_s28 = scalar_lea.vmem %s924_s1, %s840_s22 }
  0x11   : > { %v310_v6 = vld [vmem:[%s283_s25] sm:$0xff]  ;;  %s302_s17 = scalar_lea.vmem %s927_s4, %s840_s22  ;;  %s309_s24 = scalar_lea.vmem %s928_s5, %s840_s22 }
  0x12   : > { %v361_v7 = vld [vmem:[%s287_s28] sm:$0xff]  ;;  %v312_v8 = vcombine.high %v310_v6, %v310_v6  ;;  %v319_v9 = vrot.slane %v310_v6, %v318_v5  ;;  %v418_v6 = vld [vmem:[%s925_s2 + $0x30] sm:$0xff] }
  0x13   : > { %v363_v10 = vcombine.high %v361_v7, %v361_v7  ;;  %v370_v11 = vrot.slane %v361_v7, %v318_v5  ;;  %v426_v7 = vld [vmem:[%s926_s3 + $0x30] sm:$0xff] }
  0x14   : > { %v326_v12 = vrot.slane %v312_v8, %v318_v5  ;;  %v327_v13 = vcombine.high %v319_v9, %v319_v9  ;;  %v335_v14 = vrot.slane %v319_v9, %v318_v5 }
  0x15   : > { %v377_v15 = vrot.slane %v363_v10, %v318_v5  ;;  %v378_v16 = vcombine.high %v370_v11, %v370_v11  ;;  %v386_v21 = vrot.slane %v370_v11, %v318_v5 }
  0x16   : > { %v328_v18 = vcombine.high %v326_v12, %v326_v12  ;;  %v349_v19 = vrot.slane %v327_v13, %v318_v5  ;;  %v357_v20 = vcombine.high %v335_v14, %v335_v14  ;;  %v342_v23 = vrot.slane %v326_v12, %v318_v5 }
  0x17   : > { %v379_v22 = vcombine.high %v377_v15, %v377_v15  ;;  %v400_v25 = vrot.slane %v378_v16, %v318_v5  ;;  %v393_v26 = vrot.slane %v377_v15, %v318_v5  ;;  %v850_v27 = vrot.slane %v335_v14, %v430_v17  ;;  %v419_v15 = vld [vmem:[%s925_s2 + $0x38] sm:$0xff] }
  0x18   : > { %v359_v24 = vcombine.high %v349_v19, %v349_v19  ;;  %v852_v28 = vrot.slane %v349_v19, %v430_v17  ;;  %v356_v29 = vrot.slane %v328_v18, %v318_v5  ;;  %v408_v30 = vcombine.high %v386_v21, %v386_v21 }
  0x19   : > { %v410_v31 = vcombine.high %v400_v25, %v400_v25  ;;  %v439_v34 = vrot.slane %v357_v20, %v430_v17  ;;  %v407_v35 = vrot.slane %v379_v22, %v318_v5  ;;  %v358_v38 = vcombine.high %v342_v23, %v342_v23 }
  0x1a   : > { %v443_v37 = vrot.slane %v359_v24, %v430_v17  ;;  %v360_v39 = vcombine.high %v356_v29, %v356_v29  ;;  %v409_v40 = vcombine.high %v393_v26, %v393_v26  ;;  %v447_v43 = vrot.slane %v342_v23, %v430_v17 }
  0x1b   : > { %v411_v44 = vcombine.high %v407_v35, %v407_v35  ;;  %v468_v48 = vmul.f32 %v850_v27, %v412_v32  ;;  %v469_v49 = vmul.f32 %v852_v28, %v413_v33  ;;  %v479_v50 = vrot.slane %v386_v21, %v430_v17  ;;  %v427_v21 = vld [vmem:[%s926_s3 + $0x38] sm:$0xff] }
  0x1c   : > { %v470_v52 = vmul.f32 %v439_v34, %v414_v36  ;;  %v483_v53 = vrot.slane %v400_v25, %v430_v17  ;;  %v487_v54 = vrot.slane %v408_v30, %v430_v17  ;;  %v491_v55 = vrot.slane %v410_v31, %v430_v17 }
  0x1d   : > { %v451_v57 = vrot.slane %v356_v29, %v430_v17  ;;  %v471_v58 = vmul.f32 %v443_v37, %v415_v41  ;;  %v495_v59 = vrot.slane %v393_v26, %v430_v17  ;;  %v499_v60 = vrot.slane %v407_v35, %v430_v17 }
  0x1e   : > { %v516_v62 = vmul.f32 %v479_v50, %v420_v42  ;;  %v517_v63 = vmul.f32 %v483_v53, %v421_v45  ;;  %v518_v0 = vmul.f32 %v487_v54, %v422_v46  ;;  %v519_v1 = vmul.f32 %v491_v55, %v423_v47 }
  0x1f   : > { %v455_v3 = vrot.slane %v358_v38, %v430_v17  ;;  %v472_v4 = vmul.f32 %v447_v43, %v416_v51  ;;  %v503_v5 = vrot.slane %v409_v40, %v430_v17  ;;  %v520_v8 = vmul.f32 %v495_v59, %v424_v56 }
  0x20   : > { %v524_v9 = vsub.f32 %v468_v48, %v516_v62  ;;  %v525_v10 = vsub.f32 %v469_v49, %v517_v63  ;;  %v526_v11 = vsub.f32 %v470_v52, %v518_v0  ;;  %v459_v12 = vrot.slane %v360_v39, %v430_v17 }
  0x21   : > { %v473_v13 = vmul.f32 %v451_v57, %v417_v61  ;;  %v507_v14 = vrot.slane %v411_v44, %v430_v17  ;;  %v521_v16 = vmul.f32 %v499_v60, %v425_v2  ;;  %v527_v18 = vsub.f32 %v471_v58, %v519_v1 }
  0x22   : > { %v532_v19 = vadd.f32 %v525_v10, %v524_v9  ;;  %v540_v20 = vmul.f32 %v479_v50, %v412_v32  ;;  %v474_v22 = vmul.f32 %v455_v3, %v418_v6  ;;  %v522_v23 = vmul.f32 %v503_v5, %v426_v7 }
  0x23   : > { %v541_v24 = vmul.f32 %v483_v53, %v413_v33  ;;  %v542_v25 = vmul.f32 %v487_v54, %v414_v36  ;;  %v528_v26 = vsub.f32 %v472_v4, %v520_v8  ;;  %v548_v17 = vmul.f32 %v850_v27, %v420_v42 }
  0x24   : > { %v533_v29 = vadd.f32 %v532_v19, %v526_v11  ;;  %v549_v30 = vmul.f32 %v852_v28, %v421_v45  ;;  %v475_v31 = vmul.f32 %v459_v12, %v419_v15  ;;  %v543_v35 = vmul.f32 %v491_v55, %v415_v41 }
  0x25   : > { %v550_v38 = vmul.f32 %v439_v34, %v422_v46  ;;  %v551_v39 = vmul.f32 %v443_v37, %v423_v47  ;;  %v523_v40 = vmul.f32 %v507_v14, %v427_v21  ;;  %v529_v32 = vsub.f32 %v473_v13, %v521_v16 }
  0x26   : > { %v534_v44 = vadd.f32 %v533_v29, %v527_v18  ;;  %v556_v48 = vadd.f32 %v548_v17, %v540_v20  ;;  %v544_v49 = vmul.f32 %v495_v59, %v416_v51  ;;  %v552_v50 = vmul.f32 %v447_v43, %v424_v56 }
  0x27   : > { %v557_v52 = vadd.f32 %v549_v30, %v541_v24  ;;  %v558_v33 = vadd.f32 %v550_v38, %v542_v25  ;;  %v530_v36 = vsub.f32 %v474_v22, %v522_v23  ;;  %v545_v54 = vmul.f32 %v499_v60, %v417_v61 }
  0x28   : > { %v535_v53 = vadd.f32 %v534_v44, %v528_v26  ;;  %v553_v58 = vmul.f32 %v451_v57, %v425_v2  ;;  %v559_v27 = vadd.f32 %v551_v39, %v543_v35  ;;  %v531_v28 = vsub.f32 %v475_v31, %v523_v40 }
  0x29   : > { %v564_v42 = vadd.f32 %v557_v52, %v556_v48  ;;  %v546_v41 = vmul.f32 %v503_v5, %v418_v6  ;;  %v554_v34 = vmul.f32 %v455_v3, %v426_v7  ;;  %v560_v37 = vadd.f32 %v552_v50, %v544_v49 }
  0x2a   : > { %v536_v45 = vadd.f32 %v535_v53, %v529_v32  ;;  %v547_v43 = vmul.f32 %v507_v14, %v419_v15  ;;  %v555_v51 = vmul.f32 %v459_v12, %v427_v21  ;;  %v561_v55 = vadd.f32 %v553_v58, %v545_v54 }
  0x2b   : > { %v565_v46 = vadd.f32 %v564_v42, %v558_v33  ;;  %v562_v57 = vadd.f32 %v554_v34, %v546_v41 }
  0x2c   : > { %v537_v47 = vadd.f32 %v536_v45, %v530_v36  ;;  %v563_v61 = vadd.f32 %v555_v51, %v547_v43 }
  0x2d   : > { %v566_v56 = vadd.f32 %v565_v46, %v559_v27 }
  0x2e   : > { %v538_v59 = vadd.f32 %v537_v47, %v531_v28 }
  0x2f   : > { %v567_v60 = vadd.f32 %v566_v56, %v560_v37 }
  0x30   : > { %539 = vst [vmem:[%s302_s17] sm:$0xff] %v538_v59 }
  0x31   : > { %v568_v62 = vadd.f32 %v567_v60, %v561_v55 }
  0x33   : > { %v569_v63 = vadd.f32 %v568_v62, %v562_v57 }
  0x35   : > { %v570_v0 = vadd.f32 %v569_v63, %v563_v61 }
  0x37   : > { %571 = vst [vmem:[%s309_s24] sm:$0xff] %v570_v0 }
  0x38 PF: > { %s16_s20 = sadd.s32 1, %s789_s20   ;;  %s929_s18 = smov %s785_s19 }
  0x39   : > { %p13_p5 = scmp.ge.s32.totalorder %s16_s20, 4   ;;  %s930_s19 = smov %s932_s21 }
  0x3b   :  { %15 = sbr.rel (!%p13_p5) target bundleno = 2 (0x2), region = 87 }

// kernel: reverse.0
= control target key start
LH: loop header
LB: loop body
LE: loop exit
PB: predicated region body
PF: predicated region fallthrough
CT: control target
= control target key end

     0   :  { %v71_v3 = vlaneseq  ;;  %v64_v9 = vld [vmem:[#allocation0 + $0x7] ss:$-1 sm:$0xff]  ;;  %v78_v12 = vld [vmem:[#allocation0 + $0x17] ss:$-1 sm:$0xff]  ;;  %s329_s0 = inlined_call_operand.vmem [shape: f32[2,4,16,7], index: 0, kind: input, shape index: {}]   ;;  %s330_s1 = inlined_call_operand.vmem [shape: f32[2,4,16,7], index: 1, kind: output, shape index: {}]  }
   0x1   :  { %v44_v0 = vld [vmem:[%s329_s0] sm:$0xff]  ;;  %v46_v1 = vld [vmem:[%s329_s0 + $0x8] sm:$0xff]  ;;  %v48_v2 = vld [vmem:[%s329_s0 + $0x10] sm:$0xff]  ;;  %v65_v10 = vrot.slane %v64_v9, 1  ;;  %v79_v14 = vrot.slane %v78_v12, 1 }
   0x2   :  { %45 = vst [vmem:[#allocation0 + $0x8] sm:$0xff] %v44_v0  ;;  %47 = vst [vmem:[#allocation0 + $0x18] sm:$0xff] %v46_v1  ;;  %v50_v4 = vld [vmem:[%s329_s0 + $0x18] sm:$0xff]  ;;  %v52_v5 = vld [vmem:[%s329_s0 + $0x20] sm:$0xff]  ;;  %v72_v11 = vshrl.u32 %v71_v3, 7 }
   0x3   :  { %49 = vst [vmem:[#allocation0 + $0x28] sm:$0xff] %v48_v2  ;;  %v54_v6 = vld [vmem:[%s329_s0 + $0x28] sm:$0xff]  ;;  %51 = vst [vmem:[#allocation0 + $0x38] sm:$0xff] %v50_v4  ;;  %v56_v7 = vld [vmem:[%s329_s0 + $0x30] sm:$0xff] }
   0x4   :  { %53 = vst [vmem:[#allocation0 + $0x48] sm:$0xff] %v52_v5  ;;  %55 = vst [vmem:[#allocation0 + $0x58] sm:$0xff] %v54_v6  ;;  %v58_v8 = vld [vmem:[%s329_s0 + $0x38] sm:$0xff]  ;;  %v92_v13 = vld [vmem:[#allocation0 + $0x27] ss:$-1 sm:$0xff]  ;;  %vm73_vm0 = vcmp.lt.s32.totalorder %v72_v11, 7 }
   0x5   :  { %57 = vst [vmem:[#allocation0 + $0x68] sm:$0xff] %v56_v7  ;;  %59 = vst [vmem:[#allocation0 + $0x78] sm:$0xff] %v58_v8  ;;  %v93_v15 = vrot.slane %v92_v13, 1  ;;  %v106_v16 = vld [vmem:[#allocation0 + $0x37] ss:$-1 sm:$0xff] }
   0x6   :  { %66 = vst [vmem:[#allocation1] sm:$0xff] %v65_v10  ;;  %v107_v17 = vrot.slane %v106_v16, 1  ;;  %v120_v18 = vld [vmem:[#allocation0 + $0x47] ss:$-1 sm:$0xff]  ;;  %v134_v19 = vld [vmem:[#allocation0 + $0x57] ss:$-1 sm:$0xff] }
   0x7   :  { %80 = vst [vmem:[#allocation1 + $0x8] sm:$0xff] %v79_v14  ;;  %94 = vst [vmem:[#allocation1 + $0x10] sm:$0xff] %v93_v15  ;;  %v121_v20 = vrot.slane %v120_v18, 1  ;;  %v135_v21 = vrot.slane %v134_v19, 1  ;;  %v148_v22 = vld [vmem:[#allocation0 + $0x67] ss:$-1 sm:$0xff] }
   0x8   :  { %v162_v23 = vld [vmem:[#allocation0 + $0x77] ss:$-1 sm:$0xff]  ;;  %108 = vst [vmem:[#allocation1 + $0x18] sm:$0xff] %v107_v17  ;;  %v149_v24 = vrot.slane %v148_v22, 1 }
   0x9   :  { %v163_v25 = vrot.slane %v162_v23, 1  ;;  %v69_v26 = vld [vmem:[#allocation0 + $0xf] ss:$-1 sm:$0xff]  ;;  %v83_v27 = vld [vmem:[#allocation0 + $0x1f] ss:$-1 sm:$0xff]  ;;  %122 = vst [vmem:[#allocation1 + $0x20] sm:$0xff] %v121_v20 }
   0xa   :  { %v97_v28 = vld [vmem:[#allocation0 + $0x2f] ss:$-1 sm:$0xff]  ;;  %136 = vst [vmem:[#allocation1 + $0x28] sm:$0xff] %v135_v21  ;;  %v70_v29 = vrot.slane %v69_v26, 1  ;;  %v84_v30 = vrot.slane %v83_v27, 1  ;;  %150 = vst [vmem:[#allocation1 + $0x30] sm:$0xff] %v149_v24 }
   0xb   :  { %v98_v31 = vrot.slane %v97_v28, 1  ;;  %v111_v32 = vld [vmem:[#allocation0 + $0x3f] ss:$-1 sm:$0xff]  ;;  %164 = vst [vmem:[#allocation1 + $0x38] sm:$0xff] %v163_v25  ;;  %v125_v34 = vld [vmem:[#allocation0 + $0x4f] ss:$-1 sm:$0xff] }
   0xc   :  { %v112_v33 = vrot.slane %v111_v32, 1  ;;  %v139_v35 = vld [vmem:[#allocation0 + $0x5f] ss:$-1 sm:$0xff]  ;;  %74 = vst.msk [vmem:[#allocation1] sm:$0xff] %vm73_vm0, %v70_v29  ;;  %88 = vst.msk [vmem:[#allocation1 + $0x8] sm:$0xff] %vm73_vm0, %v84_v30  ;;  %v126_v36 = vrot.slane %v125_v34, 1 }
   0xd   :  { %102 = vst.msk [vmem:[#allocation1 + $0x10] sm:$0xff] %vm73_vm0, %v98_v31  ;;  %v140_v37 = vrot.slane %v139_v35, 1  ;;  %v153_v38 = vld [vmem:[#allocation0 + $0x6f] ss:$-1 sm:$0xff]  ;;  %v167_v39 = vld [vmem:[#allocation0 + $0x7f] ss:$-1 sm:$0xff] }
   0xe   :  { %116 = vst.msk [vmem:[#allocation1 + $0x18] sm:$0xff] %vm73_vm0, %v112_v33  ;;  %v154_v40 = vrot.slane %v153_v38, 1  ;;  %v168_v41 = vrot.slane %v167_v39, 1  ;;  %130 = vst.msk [vmem:[#allocation1 + $0x20] sm:$0xff] %vm73_vm0, %v126_v36 }
   0xf   :  { %144 = vst.msk [vmem:[#allocation1 + $0x28] sm:$0xff] %vm73_vm0, %v140_v37 }
  0x10   :  { %158 = vst.msk [vmem:[#allocation1 + $0x30] sm:$0xff] %vm73_vm0, %v154_v40  ;;  %172 = vst.msk [vmem:[#allocation1 + $0x38] sm:$0xff] %vm73_vm0, %v168_v41 }
  0x13   :  { %v214_v42 = vld [vmem:[#allocation1] sm:$0xff]  ;;  %v216_v43 = vld [vmem:[#allocation1 + $0x8] sm:$0xff] }
  0x14   :  { %v218_v44 = vld [vmem:[#allocation1 + $0x10] sm:$0xff]  ;;  %215 = vst [vmem:[%s330_s1] sm:$0xff] %v214_v42  ;;  %217 = vst [vmem:[%s330_s1 + $0x8] sm:$0xff] %v216_v43 }
  0x15   :  { %219 = vst [vmem:[%s330_s1 + $0x10] sm:$0xff] %v218_v44  ;;  %v220_v45 = vld [vmem:[#allocation1 + $0x18] sm:$0xff]  ;;  %v222_v46 = vld [vmem:[#allocation1 + $0x20] sm:$0xff] }
  0x16   :  { %221 = vst [vmem:[%s330_s1 + $0x18] sm:$0xff] %v220_v45  ;;  %v224_v47 = vld [vmem:[#allocation1 + $0x28] sm:$0xff]  ;;  %223 = vst [vmem:[%s330_s1 + $0x20] sm:$0xff] %v222_v46 }
  0x17   :  { %225 = vst [vmem:[%s330_s1 + $0x28] sm:$0xff] %v224_v47  ;;  %v226_v48 = vld [vmem:[#allocation1 + $0x30] sm:$0xff]  ;;  %v228_v49 = vld [vmem:[#allocation1 + $0x38] sm:$0xff] }
  0x18   :  { %227 = vst [vmem:[%s330_s1 + $0x30] sm:$0xff] %v226_v48  ;;  %229 = vst [vmem:[%s330_s1 + $0x38] sm:$0xff] %v228_v49 }

// kernel: block_forward.3
= control target key start
LH: loop header
LB: loop body
LE: loop exit
PB: predicated region body
PF: predicated region fallthrough
CT: control target
= control target key end

     0   :  { %s623_s15 = smov 0   ;;  %s625_s16 = smov 0   ;;  %s679_s0 = inlined_call_operand.vmem [shape: f32[2,4,256], index: 0, kind: input, shape index: {}]   ;;  %s680_s1 = inlined_call_operand.vmem [shape: f32[4,4], index: 1, kind: input, shape index: {}]   ;;  %s681_s2 = inlined_call_operand.vmem [shape: f32[4,1], index: 2, kind: input, shape index: {}]   ;;  %s682_s3 = inlined_call_operand.vmem [shape: f32[2,4,256], index: 3, kind: input, shape index: {}, may-alias: {3,4}]   ;;  %s683_s4 = inlined_call_operand.vmem [shape: f32[2,4,256], index: 4, kind: output, shape index: {}, may-alias: {3,4}]  }
   0x1   :  { %s627_s17 = smov 0  }
   0x2 LB: > { %s26_s18 = sadd.s32 1, %s587_s16  ;;  %p524_p0 = scmp.ge.s32.totalorder %s591_s17, 1  ;;  %s591_s17 = sphi %s627_s17, %s14_s17   ;;  %s587_s16 = sphi %s625_s16, %s685_s16   ;;  %s583_s15 = sphi %s623_s15, %s684_s15  }
   0x3   : > { %p28_p1 = scmp.ge.s32.totalorder %s26_s18, 2  ;;  %p200_p2 = scmp.lt.s32.totalorder %s591_s17, 3 }
   0x5   : > { %s687_s18 = smov (%p28_p1, %s26_s18), 0  ;;  %p201_p3 = pnand %p524_p0, %p200_p2 }
   0x6   : > { %v275_v0 = vld [vmem:[%s681_s2] sm:$0xf] (!%p201_p3)  ;;  %v593_v2 = vmov (!%p201_p3), 0   ;;  %v594_v3 = vmov (!%p201_p3), 1   ;;  %v595_v6 = vmov (!%p201_p3), 2   ;;  %v596_v8 = vmov (!%p201_p3), 3  }
   0x7   : > { %204 = sbr.rel (%p201_p3) target bundleno = 153 (0x99), region = 36  ;;  %v321_v1 = vld [vmem:[%s680_s1] sm:$0xf] (!%p201_p3)  ;;  %565 = vset.pattern.permute.xlu0 (!%p201_p3), %v593_v2  ;;  %566 = vset.pattern.permute.xlu1 (!%p201_p3), %v594_v3  ;;  %p244_p4 = scmp.lt.s32.totalorder (!%p201_p3), %s583_s15, 1  ;;  %v283_v9 = vlaneseq (!%p201_p3)  ;;  %v597_v11 = vmov (!%p201_p3), 839922192  }
   0x8   : > { %278 = vperm.xlu0 (!%p201_p3), %565, %v275_v0   ;;  %324 = vperm.xlu1 (!%p201_p3), %566, %v321_v1   ;;  %v289_v4 = vld [vmem:[%s680_s1] sm:$0xf] (!%p201_p3)  ;;  %v281_v12 = vunpack.c.l.s4 (!%p201_p3), %v597_v11 }
   0x9   : > { %v352_v5 = vld [vmem:[%s680_s1] sm:$0xf] (!%p201_p3)  ;;  %v284_v10 = vshrl.u32 (!%p201_p3), %v283_v9, 7 }
   0xa   : > { %v383_v7 = vld [vmem:[%s680_s1] sm:$0xf] (!%p201_p3)  ;;  %v282_v20 = vunpack.c.0.s8 (!%p201_p3), %v281_v12 }
   0xb   : > { %v329_v13 = vsub.s32 (!%p201_p3), 1, %v284_v10  ;;  %v333_v14 = vsub.s32 (!%p201_p3), 5, %v284_v10  ;;  %v298_v15 = vsub.s32 (!%p201_p3), 0, %v284_v10  ;;  %v302_v16 = vsub.s32 (!%p201_p3), 4, %v284_v10 }
   0xc   : > { %292 = vperm.xlu0 (!%p201_p3), %565, %v289_v4   ;;  %567 = vset.pattern.permute.xlu1 (!%p201_p3), %v595_v6  ;;  %v360_v18 = vsub.s32 (!%p201_p3), 2, %v284_v10  ;;  %v364_v19 = vsub.s32 (!%p201_p3), 6, %v284_v10  ;;  %v391_v27 = vsub.s32 (!%p201_p3), 3, %v284_v10  ;;  %v395_v28 = vsub.s32 (!%p201_p3), 7, %v284_v10 }
   0xd   : > { %355 = vperm.xlu1 (!%p201_p3), %567, %v352_v5   ;;  %v285_v29 = vsub.s32 (!%p201_p3), %v282_v20, %v284_v10 }
   0xe   : > { %s689_s15 = smov (!%p244_p4, %s583_s15), 1 }
   0xf   : > { %s656_s29 = sshll.u32 %s689_s15, 3 }
  0x10   : > { %568 = vset.pattern.permute.xlu0 %v596_v8  ;;  %s251_s6 = scalar_lea.vmem %s679_s0, %s656_s29  ;;  %s261_s9 = scalar_lea.vmem %s682_s3, %s656_s29 }
  0x11   : > { %386 = vperm.xlu0 %568, %v383_v7   ;;  %v273_v17 = vld [vmem:[%s251_s6] sm:$0xff]  ;;  %s271_s12 = scalar_lea.vmem %s683_s4, %s656_s29 }
  0x12   : > { %v330_v21 = vrot.slane %v273_v17, %v329_v13  ;;  %v334_v22 = vrot.slane %v273_v17, %v333_v14  ;;  %v299_v23 = vrot.slane %v273_v17, %v298_v15  ;;  %v303_v24 = vrot.slane %v273_v17, %v302_v16  ;;  %v274_v41 = vld [vmem:[%s261_s9] sm:$0xff] }
  0x13   : > { %v361_v25 = vrot.slane %v273_v17, %v360_v18  ;;  %v365_v26 = vrot.slane %v273_v17, %v364_v19  ;;  %v392_v38 = vrot.slane %v273_v17, %v391_v27  ;;  %v396_v39 = vrot.slane %v273_v17, %v395_v28 }
  0x14   : > { %v340_v32 = vrot.slane %v330_v21, %v329_v13  ;;  %v344_v33 = vrot.slane %v334_v22, %v329_v13  ;;  %v309_v34 = vrot.slane %v299_v23, %v298_v15  ;;  %v313_v35 = vrot.slane %v303_v24, %v298_v15 }
  0x15   : > { %v371_v36 = vrot.slane %v361_v25, %v360_v18  ;;  %v375_v37 = vrot.slane %v365_v26, %v360_v18  ;;  %v402_v50 = vrot.slane %v392_v38, %v391_v27  ;;  %v406_v51 = vrot.slane %v396_v39, %v391_v27 }
  0x87   : > { %v279_v30 = vpop.permute.xlu0 %278  ;;  %v325_v31 = vpop.permute.xlu1 %324 }
  0x88   : > { %v286_v40 = vrot.slane %v279_v30, %v285_v29  ;;  %v345_v43 = vmul.f32 %v340_v32, %v325_v31  ;;  %v346_v44 = vmul.f32 %v344_v33, %v325_v31 }
  0x8a   : > { %v288_v52 = vadd.f32 %v286_v40, %v274_v41  ;;  %v349_v54 = vcombine.low %v345_v43, %v346_v44 }
  0x8b   : > { %v293_v42 = vpop.permute.xlu0 %292 }
  0x8c   : > { %v314_v45 = vmul.f32 %v309_v34, %v293_v42  ;;  %v315_v46 = vmul.f32 %v313_v35, %v293_v42  ;;  %v356_v47 = vpop.permute.xlu1 %355 }
  0x8d   : > { %v376_v48 = vmul.f32 %v371_v36, %v356_v47  ;;  %v377_v49 = vmul.f32 %v375_v37, %v356_v47 }
  0x8e   : > { %v318_v53 = vcombine.low %v314_v45, %v315_v46 }
  0x8f   : > { %v380_v56 = vcombine.low %v376_v48, %v377_v49 }
  0x90   : > { %v320_v55 = vadd.f32 %v318_v53, %v288_v52  ;;  %v387_v57 = vpop.permute.xlu0 %386 }
  0x91   : > { %v407_v58 = vmul.f32 %v402_v50, %v387_v57  ;;  %v408_v59 = vmul.f32 %v406_v51, %v387_v57 }
  0x92   : > { %v351_v60 = vadd.f32 %v349_v54, %v320_v55 }
  0x93   : > { %v411_v61 = vcombine.low %v407_v58, %v408_v59 }
  0x94   : > { %v382_v62 = vadd.f32 %v380_v56, %v351_v60 }
  0x96   : > { %v413_v63 = vadd.f32 %v411_v61, %v382_v62 }
  0x98   : > { %414 = vst [vmem:[%s271_s12] sm:$0xff] %v413_v63 }
  0x99 PF: > { %s14_s17 = sadd.s32 1, %s591_s17   ;;  %s684_s15 = smov %s587_s16 }
  0x9a   : > { %p11_p5 = scmp.ge.s32.totalorder %s14_s17, 4   ;;  %s685_s16 = smov %s687_s18 }
  0x9c   :  { %13 = sbr.rel (!%p11_p5) target bundleno = 2 (0x2), region = 69 }

</bundles_post_ra>
